<compile_context>
chip_gen: v6e
topology: v6e:2x2x1
jax: 0.10.0
libtpu: 0.0.40
codegen_flags: <defaults>
</compile_context>

<pallas_src>
import jax
import jax.numpy as jnp
from jax.experimental import pallas as pl
from jax.experimental.pallas import tpu as pltpu


def arm_kernel(p_ref, w1_ref, b1_ref, w2_ref, b2_ref, o_ref):
    """One batch element per grid step.  Lane axis = H*W (lane-dense).

    p_ref : (1, 9*Cin, H*W)  bf16 im2col patches (tap-major K)
    w1_ref: (Cout, 9*Cin)    bf16 3x3 conv weights with BN1 scale folded in
    b1_ref: (Cout, 1)        f32 folded BN1 bias
    w2_ref: (Cout, Cout)     f32 1x1 attention conv weights with BN2 scale folded in
    b2_ref: (Cout, 1)        f32 folded BN2 bias
    o_ref : (1, Cout, H*W)   f32 output (wrapper reshapes to NCHW)
    """
    hw = o_ref.shape[-1]

    # --- 3x3 conv as a single MXU matmul; accumulation lives in the MXU (K=9*Cin) ---
    feat = jnp.dot(w1_ref[...], p_ref[0],
                   preferred_element_type=jnp.float32)            # (Cout, H*W) f32

    # --- folded BN1 bias + ReLU (scale already folded into w1) ---
    feat = jnp.maximum(feat + b1_ref[...], 0.0)

    # --- global average pool over the spatial (lane) axis ---
    gap = jnp.sum(feat, axis=1, keepdims=True) * (1.0 / hw)       # (Cout, 1)

    # --- 1x1 conv + folded BN2 bias + sigmoid (tiny epilogue, f32) ---
    atten = jnp.dot(w2_ref[...], gap, preferred_element_type=jnp.float32)
    atten = 1.0 / (1.0 + jnp.exp(-(atten + b2_ref[...])))         # (Cout, 1)

    # --- channel-wise attention scaling; lane-dense store ---
    o_ref[0] = (feat * atten).astype(o_ref.dtype)


def attention_refinement_module(x_nchw, params):
    """Pallas-backed forward. x_nchw: (N, Cin, H, W) -> (N, Cout, H, W)."""
    N, Cin, H, W = x_nchw.shape
    w1 = params["w1"]                        # (Cout, Cin, 3, 3)  torch OIHW
    w2 = params["w2"]                        # (Cout, Cout, 1, 1)
    Cout = w1.shape[0]
    HW = H * W
    eps = 1e-5

    # Fold eval-mode BN into per-channel scale/bias, then fold the scales
    # into the conv weights so the kernel only adds a bias.
    s1 = params["bn1_gamma"] / jnp.sqrt(params["bn1_var"] + eps)   # (Cout,)
    b1 = params["bn1_beta"] - params["bn1_mean"] * s1
    s2 = params["bn2_gamma"] / jnp.sqrt(params["bn2_var"] + eps)
    b2 = params["bn2_beta"] - params["bn2_mean"] * s2

    # w1: OIHW -> (Cout, 3, 3, Cin) -> (Cout, 9*Cin), tap-major K, BN1-scaled, bf16.
    w1s = (jnp.transpose(w1, (0, 2, 3, 1)).reshape(Cout, 9 * Cin)
           * s1[:, None]).astype(jnp.bfloat16)
    # w2: (out, in) with BN2 scale folded on the output dim; tiny -> keep f32.
    w2s = (w2[:, :, 0, 0] * s2[:, None]).astype(jnp.float32)
    b1c = b1.reshape(Cout, 1).astype(jnp.float32)
    b2c = b2.reshape(Cout, 1).astype(jnp.float32)

    # im2col in plain JAX (layout plumbing).  Stay channel-major (NCHW) so the
    # spatial axis lands on the lane dimension and the output is already NCHW.
    x_pad = jnp.pad(x_nchw, ((0, 0), (0, 0), (1, 1), (1, 1)))      # (N, Cin, H+2, W+2)
    taps = [x_pad[:, :, dh:dh + H, dw:dw + W]                      # 9 x (N, Cin, H, W)
            for dh in range(3) for dw in range(3)]
    patches = jnp.stack(taps, axis=1).reshape(N, 9 * Cin, HW)      # tap-major K
    patches = patches.astype(jnp.bfloat16)

    # Explicit VMEM budget: double-buffered input/output blocks + weights, clamped
    # so it leaves headroom on v7x (64 MiB physical) and exceeds the v5e/v6e
    # default scoped limits when blocks are large.
    per_step = 2 * (9 * Cin * HW * 2) + 2 * (Cout * HW * 4)
    weights = Cout * 9 * Cin * 2 + Cout * Cout * 4 + 2 * Cout * 4
    vmem_limit = int(min(max(32 * 1024 * 1024, 2 * (per_step + weights)),
                         56 * 1024 * 1024))

    out_flat = pl.pallas_call(
        arm_kernel,
        out_shape=jax.ShapeDtypeStruct((N, Cout, HW), jnp.float32),
        grid_spec=pltpu.PrefetchScalarGridSpec(
            num_scalar_prefetch=0,
            grid=(N,),
            in_specs=[
                pl.BlockSpec((1, 9 * Cin, HW), lambda n: (n, 0, 0)),
                pl.BlockSpec((Cout, 9 * Cin), lambda n: (0, 0)),
                pl.BlockSpec((Cout, 1), lambda n: (0, 0)),
                pl.BlockSpec((Cout, Cout), lambda n: (0, 0)),
                pl.BlockSpec((Cout, 1), lambda n: (0, 0)),
            ],
            out_specs=pl.BlockSpec((1, Cout, HW), lambda n: (n, 0, 0)),
        ),
        compiler_params=pltpu.CompilerParams(
            dimension_semantics=("parallel",),
            vmem_limit_bytes=vmem_limit,
        ),
    )(patches, w1s, b1c, w2s, b2c)

    return out_flat.reshape(N, Cout, H, W)


def reference_forward(x_nchw, params):
    """Plain-JAX f32 reference of the PyTorch forward (eval-mode BN)."""
    eps = 1e-5
    s1 = params["bn1_gamma"] / jnp.sqrt(params["bn1_var"] + eps)
    b1 = params["bn1_beta"] - params["bn1_mean"] * s1
    s2 = params["bn2_gamma"] / jnp.sqrt(params["bn2_var"] + eps)
    b2 = params["bn2_beta"] - params["bn2_mean"] * s2

    x = jnp.transpose(x_nchw, (0, 2, 3, 1))
    feat = jax.lax.conv_general_dilated(
        x, jnp.transpose(params["w1"], (2, 3, 1, 0)),
        window_strides=(1, 1), padding=((1, 1), (1, 1)),
        dimension_numbers=("NHWC", "HWIO", "NHWC"))
    feat = jnp.maximum(feat * s1 + b1, 0.0)
    atten = jnp.mean(feat, axis=(1, 2), keepdims=True)
    atten = jnp.einsum("nhwc,cd->nhwd", atten,
                       jnp.transpose(params["w2"][:, :, 0, 0], (1, 0)))
    atten = jax.nn.sigmoid(atten * s2 + b2)
    out = feat * atten
    return jnp.transpose(out, (0, 3, 1, 2))


def init_params(key, in_chan, out_chan):
    """Deterministic init matching the module's __init__ shapes.

    Conv weights: kaiming_normal_(a=1) -> std = sqrt(1 / fan_in).
    BN: default PyTorch init (gamma=1, beta=0, running stats 0/1).
    """
    k1, k2 = jax.random.split(key)
    std1 = (1.0 / (in_chan * 3 * 3)) ** 0.5
    std2 = (1.0 / (out_chan * 1 * 1)) ** 0.5
    return {
        "w1": jax.random.normal(k1, (out_chan, in_chan, 3, 3), jnp.float32) * std1,
        "bn1_gamma": jnp.ones((out_chan,), jnp.float32),
        "bn1_beta": jnp.zeros((out_chan,), jnp.float32),
        "bn1_mean": jnp.zeros((out_chan,), jnp.float32),
        "bn1_var": jnp.ones((out_chan,), jnp.float32),
        "w2": jax.random.normal(k2, (out_chan, out_chan, 1, 1), jnp.float32) * std2,
        "bn2_gamma": jnp.ones((out_chan,), jnp.float32),
        "bn2_beta": jnp.zeros((out_chan,), jnp.float32),
        "bn2_mean": jnp.zeros((out_chan,), jnp.float32),
        "bn2_var": jnp.ones((out_chan,), jnp.float32),
    }


if __name__ == "__main__":
    N, Cin, Cout, H, W = 2, 4, 8, 16, 16
    key = jax.random.PRNGKey(0)
    kx, kp = jax.random.split(key)
    x = jax.random.normal(kx, (N, Cin, H, W), jnp.float32)
    params = init_params(kp, Cin, Cout)

    out = jax.block_until_ready(attention_refinement_module(x, params))
    ref = jax.block_until_ready(reference_forward(x, params))

    assert out.shape == (N, Cout, H, W)
    # bf16 MXU inputs in the kernel -> compare against the f32 reference with
    # a bf16-appropriate tolerance.
    assert jnp.allclose(out, ref, rtol=5e-2, atol=5e-2), "mismatch vs reference"
    print("KERNEL_OK")
</pallas_src>

<mosaic_0001>
module attributes {stable_mosaic.version = 11 : i64} {
  func.func @arm_kernel(%arg0: i32, %arg1: memref<1x36x256xbf16, #tpu.memory_space<vmem>>, %arg2: memref<8x36xbf16, #tpu.memory_space<vmem>>, %arg3: memref<8x1xf32, #tpu.memory_space<vmem>>, %arg4: memref<8x8xf32, #tpu.memory_space<vmem>>, %arg5: memref<8x1xf32, #tpu.memory_space<vmem>>, %arg6: memref<1x8x256xf32, #tpu.memory_space<vmem>>) attributes {dimension_semantics = [#tpu.dimension_semantics<parallel>], iteration_bounds = array<i64: 2>, scalar_prefetch = 0 : i64, scratch_operands = 0 : i64, tpu.core_type = #tpu.core_type<tc>, window_params = [{transform_indices = @transform_0, window_bounds = array<i64: 1, 36, 256>}, {pipeline_mode = #tpu.pipeline_mode<synchronous>, transform_indices = @transform_1, window_bounds = array<i64: 8, 36>}, {pipeline_mode = #tpu.pipeline_mode<synchronous>, transform_indices = @transform_2, window_bounds = array<i64: 8, 1>}, {pipeline_mode = #tpu.pipeline_mode<synchronous>, transform_indices = @transform_3, window_bounds = array<i64: 8, 8>}, {pipeline_mode = #tpu.pipeline_mode<synchronous>, transform_indices = @transform_4, window_bounds = array<i64: 8, 1>}, {transform_indices = @transform_5, window_bounds = array<i64: 1, 8, 256>}]} {
    %c0 = arith.constant 0 : index
    %c0_0 = arith.constant 0 : index
    %0 = vector.load %arg2[%c0, %c0_0] : memref<8x36xbf16, #tpu.memory_space<vmem>>, vector<8x36xbf16>
    %c0_1 = arith.constant 0 : index
    %c0_2 = arith.constant 0 : index
    %c0_3 = arith.constant 0 : index
    %1 = vector.load %arg1[%c0_1, %c0_2, %c0_3] : memref<1x36x256xbf16, #tpu.memory_space<vmem>>, vector<1x36x256xbf16>
    %2 = vector.shape_cast %1 : vector<1x36x256xbf16> to vector<36x256xbf16>
    %cst = arith.constant dense<0.000000e+00> : vector<8x256xf32>
    %3 = tpu.matmul %0, %2, %cst {dimension_numbers = #tpu.dot_dimension_numbers<[1], [0], [0], [1], [0, 0, 1, 1], [], []>} : vector<8x36xbf16>, vector<36x256xbf16>, vector<8x256xf32> -> vector<8x256xf32>
    %c0_4 = arith.constant 0 : index
    %c0_5 = arith.constant 0 : index
    %4 = vector.load %arg3[%c0_4, %c0_5] : memref<8x1xf32, #tpu.memory_space<vmem>>, vector<8x1xf32>
    %5 = vector.broadcast %4 : vector<8x1xf32> to vector<8x256xf32>
    %6 = arith.addf %3, %5 : vector<8x256xf32>
    %cst_6 = arith.constant 0.000000e+00 : f32
    %7 = vector.broadcast %cst_6 : f32 to vector<8x256xf32>
    %8 = arith.maximumf %6, %7 : vector<8x256xf32>
    %cst_7 = arith.constant dense<0.000000e+00> : vector<8xf32>
    %9 = vector.multi_reduction <add>, %8, %cst_7 [1] : vector<8x256xf32> to vector<8xf32>
    %10 = vector.shape_cast %9 : vector<8xf32> to vector<8x1xf32>
    %cst_8 = arith.constant 3.906250e-03 : f32
    %11 = vector.broadcast %cst_8 : f32 to vector<8x1xf32>
    %12 = arith.mulf %10, %11 : vector<8x1xf32>
    %c0_9 = arith.constant 0 : index
    %c0_10 = arith.constant 0 : index
    %13 = vector.load %arg4[%c0_9, %c0_10] : memref<8x8xf32, #tpu.memory_space<vmem>>, vector<8x8xf32>
    %cst_11 = arith.constant dense<0.000000e+00> : vector<8x1xf32>
    %14 = tpu.matmul %13, %12, %cst_11 {dimension_numbers = #tpu.dot_dimension_numbers<[1], [0], [0], [1], [0, 0, 1, 1], [], []>} : vector<8x8xf32>, vector<8x1xf32>, vector<8x1xf32> -> vector<8x1xf32>
    %c0_12 = arith.constant 0 : index
    %c0_13 = arith.constant 0 : index
    %15 = vector.load %arg5[%c0_12, %c0_13] : memref<8x1xf32, #tpu.memory_space<vmem>>, vector<8x1xf32>
    %16 = arith.addf %14, %15 : vector<8x1xf32>
    %cst_14 = arith.constant 0.000000e+00 : f32
    %17 = vector.broadcast %cst_14 : f32 to vector<8x1xf32>
    %18 = arith.subf %17, %16 : vector<8x1xf32>
    %19 = math.exp %18 : vector<8x1xf32>
    %cst_15 = arith.constant 1.000000e+00 : f32
    %20 = vector.broadcast %cst_15 : f32 to vector<8x1xf32>
    %21 = arith.addf %20, %19 : vector<8x1xf32>
    %cst_16 = arith.constant 1.000000e+00 : f32
    %22 = vector.broadcast %cst_16 : f32 to vector<8x1xf32>
    %23 = arith.divf %22, %21 : vector<8x1xf32>
    %24 = vector.broadcast %23 : vector<8x1xf32> to vector<8x256xf32>
    %25 = arith.mulf %8, %24 : vector<8x256xf32>
    %c0_17 = arith.constant 0 : index
    %c0_18 = arith.constant 0 : index
    %c0_19 = arith.constant 0 : index
    %26 = vector.load %arg6[%c0_17, %c0_18, %c0_19] : memref<1x8x256xf32, #tpu.memory_space<vmem>>, vector<1x8x256xf32>
    %27 = vector.shape_cast %26 : vector<1x8x256xf32> to vector<8x256xf32>
    %28 = vector.shape_cast %25 : vector<8x256xf32> to vector<1x8x256xf32>
    tpu.vector_store %arg6[%c0_17, %c0_18, %c0_19], %28 {strides = array<i32>} : memref<1x8x256xf32, #tpu.memory_space<vmem>>, vector<1x8x256xf32>,
    return
  }
  func.func @transform_0(%arg0: i32) -> (i32, i32, i32) {
    %c0_i32 = arith.constant 0 : i32
    %c0_i32_0 = arith.constant 0 : i32
    %c0_i32_1 = arith.constant 0 : i32
    return %arg0, %c0_i32, %c0_i32_0 : i32, i32, i32
  }
  func.func @transform_1(%arg0: i32) -> (i32, i32) {
    %c0_i32 = arith.constant 0 : i32
    %c0_i32_0 = arith.constant 0 : i32
    %c0_i32_1 = arith.constant 0 : i32
    return %c0_i32, %c0_i32_0 : i32, i32
  }
  func.func @transform_2(%arg0: i32) -> (i32, i32) {
    %c0_i32 = arith.constant 0 : i32
    %c0_i32_0 = arith.constant 0 : i32
    %c0_i32_1 = arith.constant 0 : i32
    return %c0_i32, %c0_i32_0 : i32, i32
  }
  func.func @transform_3(%arg0: i32) -> (i32, i32) {
    %c0_i32 = arith.constant 0 : i32
    %c0_i32_0 = arith.constant 0 : i32
    %c0_i32_1 = arith.constant 0 : i32
    return %c0_i32, %c0_i32_0 : i32, i32
  }
  func.func @transform_4(%arg0: i32) -> (i32, i32) {
    %c0_i32 = arith.constant 0 : i32
    %c0_i32_0 = arith.constant 0 : i32
    %c0_i32_1 = arith.constant 0 : i32
    return %c0_i32, %c0_i32_0 : i32, i32
  }
  func.func @transform_5(%arg0: i32) -> (i32, i32, i32) {
    %c0_i32 = arith.constant 0 : i32
    %c0_i32_0 = arith.constant 0 : i32
    %c0_i32_1 = arith.constant 0 : i32
    return %arg0, %c0_i32, %c0_i32_0 : i32, i32, i32
  }
}

</mosaic_0001>

<bundles_post_ra>
// kernel: tpu_custom_call.1
= control target key start
LH: loop header
LB: loop body
LE: loop exit
PB: predicated region body
PF: predicated region fallthrough
CT: control target
= control target key end

     0   :  { %10 = vsyncpa [#allocation3], 0  ;;  %s770_s0 = inlined_call_operand.vmem [shape: bf16[2,36,256], index: 0, kind: input, shape index: {}]   ;;  %s771_s1 = inlined_call_operand.vmem [shape: bf16[8,36], index: 1, kind: input, shape index: {}]   ;;  %s772_s2 = inlined_call_operand.vmem [shape: f32[8,1], index: 2, kind: input, shape index: {}]   ;;  %s773_s3 = inlined_call_operand.vmem [shape: f32[8,8], index: 3, kind: input, shape index: {}]   ;;  %s774_s4 = inlined_call_operand.vmem [shape: f32[8,1], index: 4, kind: input, shape index: {}]   ;;  %s775_s5 = inlined_call_operand.hbm [shape: f32[2,8,256], index: 5, kind: output, shape index: {}]  }
   0x1   :  { %12 = vsyncpa [#allocation3 + $0x1], 0  ;;  %s665_s18 = smov 0   ;;  %s667_s19 = smov 0  }
   0x2   :  { %s669_s20 = smov 0   ;;  %s671_s21 = smov 0  }
   0x3 LB: > { %s686_s22 = sadd.s32 4294967295, %s629_s21   ;;  %s484_s23 = sadd.s32 4294967294, %s629_s21   ;;  %s629_s21 = sphi %s671_s21, %s781_s21   ;;  %s625_s20 = sphi %s669_s20, %s780_s20   ;;  %s621_s19 = sphi %s667_s19, %s779_s19   ;;  %s617_s18 = sphi %s665_s18, %s778_s18  }
   0x4   : > { %s690_s24 = sadd.s32 1, %s629_s21   ;;  %s135_s25 = sadd.s32 1, %s625_s20 }
   0x5   : > { %s132_s26 = ssub.s32 %s629_s21, %s690_s24  ;;  %p145_p0 = scmp.ne.s32.totalorder %s625_s20, %s621_s19 }
   0x6   : > { %p133_p1 = scmp.eq.s32.totalorder %s132_s26, 0  ;;  %p146_p2 = scmp.eq.s32.totalorder %s686_s22, 1 }
   0x7   : > { %p151_p3 = scmp.ne.s32.totalorder %s621_s19, %s617_s18  ;;  %p152_p4 = scmp.eq.s32.totalorder %s484_s23, 1 }
   0x8   : > { %s701_s27 = scalar_select %p133_p1, %s625_s20, %s135_s25  }
   0x9   : > { %p703_p5 = por %p146_p2, %p145_p0  ;;  %p707_p6 = por %p152_p4, %p151_p3 }
   0xa   : > { %p487_p7 = scmp.ge.s32.totalorder %s629_s21, 1  ;;  %p190_p8 = scmp.lt.s32.totalorder %s629_s21, 3 }
   0xc   : > { %p191_p9 = pnand %p487_p7, %p190_p8 }
   0xd   : > { %p218_p10 = scmp.lt.s32.totalorder (!%p191_p9), %s686_s22, 1  ;;  %s215_s23 = sand.u32 (!%p191_p9), 1, %s621_s19  }
   0xe   : > { %194 = sbr.rel (%p191_p9) target bundleno = 749 (0x2ed), region = 40  ;;  %s488_s25 = sshll.u32 (!%p191_p9), %s215_s23, 4 }
   0xf   : > { %s504_s26 = sshll.u32 (!%p191_p9), %s686_s22, 8  ;;  %s217_s30 = scalar_lea.vmem (!%p191_p9), [#allocation2], %s488_s25 }
  0x10   : > { %s425_s6 = sshll.u32 (!%p191_p9), %s217_s30, 4  ;;  %s735_s9 = scalar_lea.hbm (!%p191_p9), %s775_s5, %s504_s26  ;;  %s426_s6 = int_to_ptr.vmem [resolvable:$true] %s425_s6 }
  0x11   : > { %s411_s10 = scalar_lea.sflag (!%p191_p9), [#allocation3], %s215_s23 }
  0x13   : > { %v631_v0 = vmov 0   ;;  %v230_v1 = vld [vmem:[%s772_s2] sm:$0xff]  ;;  %s219_s7 = scalar_select %p218_p10, %s686_s22, 1  ;;  %vm265_vm0 = vcmask 1041408   ;;  %vm261_vm1 = vcmask 293888   ;;  %v632_v21 = vmov 0.0  }
  0x14   : > { %304 = vmatprep.mubr.bf16.mxu0 %v631_v0  ;;  %555 = vset.pattern.permute.xlu0 %v631_v0  ;;  %v224_v10 = vld [vmem:[%s771_s1] sm:$0xf]  ;;  %vm633_vm2 = vmmov 0   ;;  %vm321_vm3 = vcmask 64512   ;;  %s634_s22 = smov [#allocation2]  }
  0x15   : > { %233 = vperm.xlu0 %555, %v230_v1   ;;  %556 = vset.pattern.permute.xlu1 %v631_v0  ;;  %s512_s8 = smul.u32 40, %s219_s7  ;;  %v319_v24 = vld [vmem:[%s773_s3] sm:$0xff]  ;;  %s573_s12 = sshll.u32 %s634_s22, 4  ;;  %s574_s12 = int_to_ptr.vmem [resolvable:$false] %s573_s12 }
  0x16   : > { %507 = vmatprep.subr.mxu1 %v632_v21  ;;  %509 = vmatprep.mubr.msk.f32.mxu1 %vm633_vm2, %v632_v21  ;;  %v320_v25 = vld [vmem:[%s774_s4] sm:$0xff]  ;;  %s575_s13 = scalar_lea.vmem %s574_s12, 512  ;;  %p576_p0 = scmp.lt.s32.totalorder %s426_s6, %s574_s12 }
  0x17   : > { %s222_s11 = scalar_lea.vmem %s770_s0, %s512_s8 }
  0x18   : > { %v229_v2 = vld [vmem:[%s222_s11 + $0x20] sm:$0x33]  ;;  %v559_v5 = vld [vmem:[%s222_s11 + $0x14] ss:$8 sps:$4 sm:$0xff]   ;;  %v561_v7 = vld [vmem:[%s222_s11 + $0x10] ss:$8 sps:$4 sm:$0xff]  }
  0x19   : > { %v495_v3 = vcombine.high %v229_v2, %v229_v2  ;;  %v494_v4 = vcombine.low %v229_v2, %v229_v2  ;;  %v562_v8 = vld [vmem:[%s222_s11 + $0x4] ss:$8 sps:$4 sm:$0xff]   ;;  %v564_v9 = vld [vmem:[%s222_s11] ss:$8 sps:$4 sm:$0xff]   ;;  %s569_s11 = scalar_lea.vmem %s426_s6, 256 }
  0x1a   : > { %p570_p11 = scmp.ne.s32.totalorder %s426_s6, %s569_s11  ;;  %p577_p1 = scmp.lt.s32.totalorder %s575_s13, %s569_s11 }
  0x1b   : > { %496 = vmatprep.subr.msk.bf16.mxu0 %vm265_vm0, %v495_v3  ;;  %v267_v6 = vsel %vm265_vm0, %v494_v4, 0 }
  0x1c   : > { %283 = vmatpush1.bf16.msra.mxu0 %v267_v6  ;;  %p571_p12 = pnand %p570_p11, %p703_p5  ;;  %p578_p2 = por %p577_p1, %p576_p0 }
  0x1d   : > { %284 = vmatprep.subr.bf16.mxu0 %v559_v5 }
  0x1e   : > { %p572_p13 = pneg %p571_p12 }
  0x20   : > { %285 = vmatpush1.bf16.msra.mxu0 %v561_v7  ;;  %p579_p3 = pnand %p578_p2, %p572_p13 }
  0x21   : > { %286 = vmatprep.subr.bf16.mxu0 %v562_v8 }
  0x24   : > { %287 = vmatpush1.bf16.msra.mxu0 %v564_v9 }
  0x27   : > { %497 = vmatmul.mubr.msk.bf16.vlgmr.msra.gmra.mxu0 %vm261_vm1, %v224_v10 }
  0x90   : > { %v234_v11 = vpop.permute.xlu0 %233 }
  0xe7   : > { %v306_v12 = vpop.f32.mrf.mxu0 }
  0xe8   : > { %v307_v13 = vadd.f32 %v306_v12, %v234_v11 }
  0xe9   : > { %v308_v14 = vpop.f32.mrf.mxu0 }
  0xea   : > { %v309_v15 = vadd.f32 %v308_v14, %v234_v11  ;;  %v313_v17 = vmax.f32 %v307_v13, 0.0 }
  0xeb   : > { %v310_v16 = vpop.f32.mrf.mxu0 }
  0xec   : > { %v314_v18 = vmax.f32 %v309_v15, 0.0 }
  0xed   : > { %v311_v19 = vpop.f32.mrf.mxu0 }
  0xee   : > { %v315_v20 = vadd.f32 %v314_v18, %v313_v17 }
  0xf0   : > { %316 = vadd.xlane.f32.xlu0 %v315_v20 }
 0x179   : > { %v317_v22 = vpop.xlane.xlu0 %316 }
 0x17a   : > { %v318_v23 = vmul.f32 0.00390625, %v317_v22 }
 0x17c   : > { %508 = vmatpush3.msra.mxu1 %v318_v23 }
 0x17d   : > { %510 = vmatmul.mubr.msk.f32.vlgmr.msra.gmra.mxu1 %vm321_vm3, %v319_v24 }
 0x23d   : > { %v391_v26 = vpop.f32.mrf.mxu1 }
 0x23e   : > { %v392_v27 = vadd.f32 %v391_v26, %v320_v25 }
 0x23f   : > { %v511_v28 = vpop.f32.mrf.mxu1 }
 0x240   : > { %v395_v29 = vsub.f32 0.0, %v392_v27 }
 0x242   : > { %v396_v30 = vmul.f32 1.442695, %v395_v29 }
 0x244   : > { %565 = vpow2.f32 %v396_v30 }
 0x251   : > { %v566_v31 = vpop.eup %565 }
 0x252   : > { %v398_v32 = vadd.f32 1.0, %v566_v31 }
 0x254   : > { %567 = vrcp.f32 %v398_v32 }
 0x261   : > { %v568_v33 = vpop.eup %567 }
 0x262   : > { %403 = vperm.xlu1 %556, %v568_v33  }
 0x2dd   : > { %v404_v34 = vpop.permute.xlu1 %403 }
 0x2de   : > { %v406_v35 = vmul.f32 %v404_v34, %v313_v17  ;;  %v407_v36 = vmul.f32 %v404_v34, %v314_v18 }
 0x2e0   : > { %408 = vst [vmem:[%s217_s30] sm:$0xff] %v406_v35  ;;  %409 = vst [vmem:[%s217_s30 + $0x8] sm:$0xff] %v407_v36 }
 0x2e1   : > { %582 = shalt.err (!%p579_p3)
}
 0x2e2   : > { %s583_s14 = scalar_lea.hbm %s735_s9, 256  ;;  %s587_s17 = scalar_lea.hbm %s775_s5, 512 }
 0x2e3   : > { %p584_p4 = scmp.ne.s32.totalorder %s735_s9, %s583_s14  ;;  %p588_p9 = scmp.lt.s32.totalorder %s735_s9, %s775_s5 }
 0x2e4   : > { %p589_p10 = scmp.lt.s32.totalorder %s587_s17, %s583_s14 }
 0x2e5   : > { %p585_p7 = pnand %p584_p4, %p703_p5 }
 0x2e6   : > { %p590_p11 = por %p589_p10, %p588_p9 }
 0x2e7   : > { %p586_p8 = pneg %p585_p7 }
 0x2e9   : > { %p591_p12 = pnand %p590_p11, %p586_p8 }
 0x2eb   : > { %594 = shalt.err (!%p591_p12)
}
 0x2ec   : > { %513 = dma.vmem_to_hbm [thread:$0]  (%p703_p5), %s426_s6, 256, %s735_s9, %s411_s10  }
 0x2ed PF: > { %p519_p13 = scmp.ge.s32.totalorder %s629_s21, 2  ;;  %s437_s26 = sand.u32 1, %s617_s18  }
 0x2ee   : > { %s438_s30 = scalar_lea.sflag [#allocation3], %s437_s26 }
 0x2ef   : > { %p516_p0 = pnand %p519_p13, %p707_p6 }
 0x2f1   : > { %p517_p1 = pneg %p516_p0 }
 0x2f3   : > { %612 = dma.done.wait (%p517_p1), %s438_s30, 256  }
 0x2f4   : > { %614 = vsyncadd (%p517_p1), %s438_s30, 4294967040  ;;  %p15_p2 = scmp.ge.s32.totalorder %s690_s24, 4   ;;  %s778_s18 = smov %s621_s19 }
 0x2f5   : > { %s779_s19 = smov %s625_s20  ;;  %s780_s20 = smov %s701_s27 }
 0x2f6   : > { %s781_s21 = smov %s690_s24  ;;  %17 = sbr.rel (!%p15_p2) target bundleno = 3 (0x3), region = 75 }
 0x2fb   :  { %443 = vsyncpa [#allocation3], 1 }
 0x2fc   :  { %445 = vsyncpa [#allocation3 + $0x1], 1 }

</bundles_post_ra>
